<compile_context>
chip_gen: v6e
topology: v6e:2x2x1
jax: 0.10.0
libtpu: 0.0.40
codegen_flags: <defaults>
</compile_context>

<pallas_src>
import functools

import jax
import jax.numpy as jnp
from jax import lax
from jax.experimental import pallas as pl
from jax.experimental.pallas import tpu as pltpu


def _round_up(v: int, m: int) -> int:
    return ((v + m - 1) // m) * m


def _rbf_kernel(gamma_ref, x_ref, c_ref, o_ref, *, chunk, n_centers):
    """One grid step: expand `tile` samples against all centers.

    gamma_ref : (1, 1)      f32, SMEM   (runtime scalar, traced-safe)
    x_ref     : (1, tile)   f32, VMEM   (samples on the lane axis -> dense loads)
    c_ref     : (C_pad, 1)  f32, VMEM   (centers on sublanes, resident across steps)
    o_ref     : (tile, C)        VMEM   (natural (samples, centers) output block)
    """
    neg_gamma = -gamma_ref[0, 0]
    c = c_ref[...]                       # hoisted: loaded once per grid step
    tile = x_ref.shape[1]
    n_chunks = tile // chunk             # static

    def body(j, carry):
        off = pl.multiple_of(j * chunk, chunk)
        x = x_ref[:, pl.ds(off, chunk)]              # (1, chunk) lane-dense load
        d = x - c                                    # (C_pad, chunk)
        y = jnp.exp(neg_gamma * d * d)               # exactly 1 exp + 3 VPU ops/elem
        # XLU transpose of the dense block, then store the natural layout
        # directly (no separate XLA transpose pass over HBM).
        y_t = jnp.transpose(y)                       # (chunk, C_pad)
        o_ref[pl.ds(off, chunk), :] = y_t[:, :n_centers].astype(o_ref.dtype)
        return carry

    lax.fori_loop(0, n_chunks, body, 0)


def rbf_forward(x, centers, gamma, *, tile_lanes=32768, out_dtype=jnp.float32):
    """RBF expansion: exp(-gamma * (x - centers)^2).

    Returns (N, n_centers) with N = x.size, matching the PyTorch module.
    Pass out_dtype=jnp.bfloat16 to halve HBM write traffic when the consumer
    tolerates it (exp is computed in f32 regardless).
    """
    centers = jnp.asarray(centers, jnp.float32).reshape(-1)
    n_centers = int(centers.shape[0])
    c_pad = max(_round_up(n_centers, 8), 8)                     # sublane-aligned
    centers_col = jnp.pad(centers, (0, c_pad - n_centers)).reshape(c_pad, 1)

    x_row = jnp.asarray(x, jnp.float32).reshape(1, -1)          # (1, N)
    n = int(x_row.shape[1])
    out_itemsize = jnp.dtype(out_dtype).itemsize

    # ---- lane-tile selection -------------------------------------------
    n128 = _round_up(n, 128)
    # Double-buffered VMEM bytes per tile lane: the (tile, C) output block pads
    # its minor dim to 128 lanes; the (1, tile) x block pads sublanes to 8.
    bytes_per_lane = 2 * (128 * out_itemsize + 8 * 4)
    vmem_budget = 40 * 1024 * 1024
    max_tile = min(_round_up(max(int(tile_lanes), 128), 128),
                   (vmem_budget // bytes_per_lane) // 128 * 128)
    max_tile = max(max_tile, 128)
    # v7x has 2 TensorCores: give the "parallel" grid axis >= 2 steps once the
    # problem is big enough to be worth splitting.
    min_steps = 2 if n128 >= 2 * 8192 else 1
    num_steps = max(pl.cdiv(n128, max_tile), min_steps)
    # Balance the tile so the last grid step is not mostly padding.
    tile = max(128, _round_up(pl.cdiv(n128, num_steps), 128))
    num_steps = pl.cdiv(n128, tile)
    n_pad = num_steps * tile

    if n_pad != n:
        x_row = jnp.pad(x_row, ((0, 0), (0, n_pad - n)))        # cheap: 4*N bytes

    chunk = 256 if tile % 256 == 0 else 128
    gamma_arr = jnp.asarray(gamma, jnp.float32).reshape(1, 1)

    cost = pl.CostEstimate(
        flops=3 * n * n_centers,                     # sub, mul, mul per element
        transcendentals=n * n_centers,               # one exp per element
        bytes_accessed=4 * (n_pad + n_centers) + n * n_centers * out_itemsize,
    )
    vmem_limit = int(min(48 * 1024 * 1024,
                         max(16 * 1024 * 1024,
                             tile * bytes_per_lane + 2 * 1024 * 1024)))

    out = pl.pallas_call(
        functools.partial(_rbf_kernel, chunk=chunk, n_centers=n_centers),
        out_shape=jax.ShapeDtypeStruct((n, n_centers), out_dtype),
        grid_spec=pltpu.PrefetchScalarGridSpec(
            num_scalar_prefetch=0,
            grid=(num_steps,),
            in_specs=[
                pl.BlockSpec(memory_space=pltpu.MemorySpace.SMEM),   # gamma scalar
                pl.BlockSpec((1, tile), lambda i: (0, i)),           # x, lane-dense
                pl.BlockSpec((c_pad, 1), lambda i: (0, 0)),          # centers, resident
            ],
            out_specs=pl.BlockSpec((tile, n_centers), lambda i: (i, 0)),
        ),
        compiler_params=pltpu.CompilerParams(
            dimension_semantics=("parallel",),       # shard grid across TCs (v7x)
            vmem_limit_bytes=vmem_limit,
        ),
        cost_estimate=cost,
    )(gamma_arr, x_row, centers_col)

    return out


if __name__ == "__main__":
    key = jax.random.PRNGKey(0)

    # Deterministic "module parameters": 20 centers in [0, 2), gamma = 10.0.
    centers = jnp.arange(0.0, 2.0, 0.1, dtype=jnp.float32)
    gamma = 10.0

    # Small example input consistent with the forward (anything flattenable).
    x = jax.random.uniform(key, (2, 64), dtype=jnp.float32, minval=0.0, maxval=2.0)

    y = rbf_forward(x, centers, gamma)
    y = jax.block_until_ready(y)

    # Reference check in plain JAX.
    x_flat = jnp.reshape(x, (-1, 1))
    y_ref = jnp.exp(-gamma * jnp.square(x_flat - jnp.reshape(centers, (1, -1))))
    assert y.shape == (128, 20), y.shape
    assert jnp.allclose(y, y_ref, atol=1e-5, rtol=1e-5), float(
        jnp.max(jnp.abs(y - y_ref))
    )

    print("KERNEL_OK")
</pallas_src>

<mosaic_0001>
module attributes {stable_mosaic.version = 11 : i64} {
  func.func @_rbf_kernel(%arg0: i32, %arg1: memref<1x1xf32, #tpu.memory_space<smem>>, %arg2: memref<1x128xf32, #tpu.memory_space<vmem>>, %arg3: memref<24x1xf32, #tpu.memory_space<vmem>>, %arg4: memref<128x20xf32, #tpu.memory_space<vmem>>) attributes {dimension_semantics = [#tpu.dimension_semantics<parallel>], iteration_bounds = array<i64: 1>, scalar_prefetch = 0 : i64, scratch_operands = 0 : i64, tpu.core_type = #tpu.core_type<tc>, window_params = [{transform_indices = @transform_0, window_bounds = array<i64: 1, 1>}, {transform_indices = @transform_1, window_bounds = array<i64: 1, 128>}, {pipeline_mode = #tpu.pipeline_mode<synchronous>, transform_indices = @transform_2, window_bounds = array<i64: 24, 1>}, {transform_indices = @transform_3, window_bounds = array<i64: 128, 20>}]} {
    %c0 = arith.constant 0 : index
    %c0_0 = arith.constant 0 : index
    %0 = memref.load %arg1[%c0, %c0_0] : memref<1x1xf32, #tpu.memory_space<smem>>
    %cst = arith.constant 0.000000e+00 : f32
    %1 = arith.subf %cst, %0 : f32
    %c0_1 = arith.constant 0 : index
    %c0_2 = arith.constant 0 : index
    %2 = vector.load %arg3[%c0_1, %c0_2] : memref<24x1xf32, #tpu.memory_space<vmem>>, vector<24x1xf32>
    %c0_i32 = arith.constant 0 : i32
    %c128_i32 = arith.constant 128 : i32
    %3 = arith.muli %c0_i32, %c128_i32 : i32
    %4 = tpu.assume_multiple %3, 128 : i32
    %c0_3 = arith.constant 0 : index
    %5 = arith.index_cast %4 : i32 to index
    %6 = vector.load %arg2[%c0_3, %5] : memref<1x128xf32, #tpu.memory_space<vmem>>, vector<1x128xf32>
    %7 = vector.broadcast %6 : vector<1x128xf32> to vector<24x128xf32>
    %8 = vector.broadcast %2 : vector<24x1xf32> to vector<24x128xf32>
    %9 = arith.subf %7, %8 : vector<24x128xf32>
    %10 = vector.broadcast %1 : f32 to vector<24x128xf32>
    %11 = arith.mulf %10, %9 : vector<24x128xf32>
    %12 = arith.mulf %11, %9 : vector<24x128xf32>
    %13 = math.exp %12 : vector<24x128xf32>
    %14 = tpu.transpose %13, [1, 0] : vector<24x128xf32> -> vector<128x24xf32>
    %15 = vector.extract_strided_slice %14 {offsets = [0, 0], sizes = [128, 20], strides = [1, 1]} : vector<128x24xf32> to vector<128x20xf32>
    %16 = arith.index_cast %4 : i32 to index
    %c0_4 = arith.constant 0 : index
    %17 = vector.load %arg4[%16, %c0_4] : memref<128x20xf32, #tpu.memory_space<vmem>>, vector<128x20xf32>
    tpu.vector_store %arg4[%16, %c0_4], %15 {strides = array<i32>} : memref<128x20xf32, #tpu.memory_space<vmem>>, vector<128x20xf32>,
    %c1_i32 = arith.constant 1 : i32
    return
  }
  func.func @transform_0(%arg0: i32) -> (i32, i32) {
    %c0_i32 = arith.constant 0 : i32
    %c0_i32_0 = arith.constant 0 : i32
    %c0_i32_1 = arith.constant 0 : i32
    return %c0_i32, %c0_i32_0 : i32, i32
  }
  func.func @transform_1(%arg0: i32) -> (i32, i32) {
    %c0_i32 = arith.constant 0 : i32
    %c0_i32_0 = arith.constant 0 : i32
    return %c0_i32, %arg0 : i32, i32
  }
  func.func @transform_2(%arg0: i32) -> (i32, i32) {
    %c0_i32 = arith.constant 0 : i32
    %c0_i32_0 = arith.constant 0 : i32
    %c0_i32_1 = arith.constant 0 : i32
    return %c0_i32, %c0_i32_0 : i32, i32
  }
  func.func @transform_3(%arg0: i32) -> (i32, i32) {
    %c0_i32 = arith.constant 0 : i32
    %c0_i32_0 = arith.constant 0 : i32
    return %arg0, %c0_i32 : i32, i32
  }
}

</mosaic_0001>

<bundles_post_ra>
// kernel: tpu_custom_call.1
= control target key start
LH: loop header
LB: loop body
LE: loop exit
PB: predicated region body
PF: predicated region fallthrough
CT: control target
= control target key end

     0   :  { %v122_v0 = vmov 0   ;;  %vm90_vm0 = vcmask 162816   ;;  %s222_s2 = inlined_call_operand.vmem [shape: f32[24,1], index: 2, kind: input, shape index: {}]   ;;  %s223_s0 = inlined_call_operand.<no memory space> [shape: f32[1,1], index: 0, kind: input, shape index: {}]   ;;  %s224_s1 = inlined_call_operand.vmem [shape: f32[1,128], index: 1, kind: input, shape index: {}]   ;;  %s225_s3 = inlined_call_operand.vmem [shape: f32[128,20], index: 3, kind: output, shape index: {}]  }
   0x1   :  { %114 = vset.pattern.permute.xlu0 %v122_v0  ;;  %v17_v1 = vld [vmem:[%s222_s2] sm:$0xff]  ;;  %115 = vset.pattern.permute.xlu1 %v122_v0  ;;  %v19_v2 = vld [vmem:[%s222_s2 + $0x10] sm:$0xff]  ;;  %v18_v3 = vld [vmem:[%s222_s2 + $0x8] sm:$0xff]  ;;  %s16_s20 = ssub.f32 0.0, %s223_s0 }
   0x2   :  { %29 = vperm.xlu0 %114, %v17_v1   ;;  %39 = vperm.xlu1 %115, %v19_v2   ;;  %v111_v4 = vld [vmem:[%s224_s1] ss:$0 sm:$0xff] }
   0x3   :  { %v45_v6 = vstv %s16_s20 }
   0x6   :  { %34 = vperm.xlu0 %114, %v18_v3  }
  0x7d   :  { %v30_v5 = vpop.permute.xlu0 %29  ;;  %v40_v7 = vpop.permute.xlu1 %39 }
  0x7e   :  { %v42_v8 = vsub.f32 %v111_v4, %v30_v5  ;;  %v44_v9 = vsub.f32 %v111_v4, %v40_v7 }
  0x80   :  { %v46_v10 = vmul.f32 %v45_v6, %v42_v8  ;;  %v48_v14 = vmul.f32 %v45_v6, %v44_v9 }
  0x81   :  { %v35_v11 = vpop.permute.xlu0 %34 }
  0x82   :  { %v49_v12 = vmul.f32 %v46_v10, %v42_v8  ;;  %v43_v13 = vsub.f32 %v111_v4, %v35_v11  ;;  %v51_v18 = vmul.f32 %v48_v14, %v44_v9 }
  0x84   :  { %v52_v15 = vmul.f32 1.442695, %v49_v12  ;;  %v47_v16 = vmul.f32 %v45_v6, %v43_v13  ;;  %v56_v20 = vmul.f32 1.442695, %v51_v18 }
  0x86   :  { %116 = vpow2.f32 %v52_v15  ;;  %v50_v17 = vmul.f32 %v47_v16, %v43_v13 }
  0x88   :  { %v54_v19 = vmul.f32 1.442695, %v50_v17 }
  0x8a   :  { %118 = vpow2.f32 %v54_v19 }
  0x8b   :  { %120 = vpow2.f32 %v56_v20 }
  0x93   :  { %v117_v21 = vpop.eup %116 }
  0x94   :  { %58 = vxpose.xlu1.b32.start [1/3] (short) %v117_v21, 128 }
  0x97   :  { %v119_v22 = vpop.eup %118 }
  0x98   :  { %59 = vxpose.xlu1.b32.cont [2/3] (short) %v119_v22, 128  ;;  %v121_v23 = vpop.eup %120 }
  0x9c   :  { %60 = vxpose.xlu1.b32.end [3/3] (short) %v121_v23, 128 }
 0x110   :  { %v74_v24 = vpop.trf.xlu1 }
 0x111   :  { %91 = vst.msk [vmem:[%s225_s3] sm:$0xff] %vm90_vm0, %v74_v24 }
 0x114   :  { %v75_v25 = vpop.trf.xlu1 }
 0x115   :  { %92 = vst.msk [vmem:[%s225_s3 + $0x8] sm:$0xff] %vm90_vm0, %v75_v25 }
 0x118   :  { %v76_v26 = vpop.trf.xlu1 }
 0x119   :  { %93 = vst.msk [vmem:[%s225_s3 + $0x10] sm:$0xff] %vm90_vm0, %v76_v26 }
 0x11c   :  { %v77_v27 = vpop.trf.xlu1 }
 0x11d   :  { %94 = vst.msk [vmem:[%s225_s3 + $0x18] sm:$0xff] %vm90_vm0, %v77_v27 }
 0x120   :  { %v78_v28 = vpop.trf.xlu1 }
 0x121   :  { %95 = vst.msk [vmem:[%s225_s3 + $0x20] sm:$0xff] %vm90_vm0, %v78_v28 }
 0x124   :  { %v79_v29 = vpop.trf.xlu1 }
 0x125   :  { %96 = vst.msk [vmem:[%s225_s3 + $0x28] sm:$0xff] %vm90_vm0, %v79_v29 }
 0x128   :  { %v80_v30 = vpop.trf.xlu1 }
 0x129   :  { %97 = vst.msk [vmem:[%s225_s3 + $0x30] sm:$0xff] %vm90_vm0, %v80_v30 }
 0x12c   :  { %v81_v31 = vpop.trf.xlu1 }
 0x12d   :  { %98 = vst.msk [vmem:[%s225_s3 + $0x38] sm:$0xff] %vm90_vm0, %v81_v31 }
 0x130   :  { %v82_v32 = vpop.trf.xlu1 }
 0x131   :  { %99 = vst.msk [vmem:[%s225_s3 + $0x40] sm:$0xff] %vm90_vm0, %v82_v32 }
 0x134   :  { %v83_v33 = vpop.trf.xlu1 }
 0x135   :  { %100 = vst.msk [vmem:[%s225_s3 + $0x48] sm:$0xff] %vm90_vm0, %v83_v33 }
 0x138   :  { %v84_v34 = vpop.trf.xlu1 }
 0x139   :  { %101 = vst.msk [vmem:[%s225_s3 + $0x50] sm:$0xff] %vm90_vm0, %v84_v34 }
 0x13c   :  { %v85_v35 = vpop.trf.xlu1 }
 0x13d   :  { %102 = vst.msk [vmem:[%s225_s3 + $0x58] sm:$0xff] %vm90_vm0, %v85_v35 }
 0x140   :  { %v86_v36 = vpop.trf.xlu1 }
 0x141   :  { %103 = vst.msk [vmem:[%s225_s3 + $0x60] sm:$0xff] %vm90_vm0, %v86_v36 }
 0x144   :  { %v87_v37 = vpop.trf.xlu1 }
 0x145   :  { %104 = vst.msk [vmem:[%s225_s3 + $0x68] sm:$0xff] %vm90_vm0, %v87_v37 }
 0x148   :  { %v88_v38 = vpop.trf.xlu1 }
 0x149   :  { %105 = vst.msk [vmem:[%s225_s3 + $0x70] sm:$0xff] %vm90_vm0, %v88_v38 }
 0x14c   :  { %v89_v39 = vpop.trf.xlu1 }
 0x14d   :  { %106 = vst.msk [vmem:[%s225_s3 + $0x78] sm:$0xff] %vm90_vm0, %v89_v39 }

</bundles_post_ra>
